<compile_context>
chip_gen: v5e
topology: v5e:2x2
jax: 0.10.0
libtpu: 0.0.40
codegen_flags: <defaults>
</compile_context>

<pallas_src>
import math
import functools

import jax
import jax.numpy as jnp
from jax.experimental import pallas as pl
from jax.experimental.pallas import tpu as pltpu


def _layernorm(x, gamma, beta, eps=1e-5):
    # x: (T, C) f32, gamma/beta: (1, C) f32
    mu = jnp.mean(x, axis=-1, keepdims=True)
    var = jnp.mean(jnp.square(x - mu), axis=-1, keepdims=True)
    return (x - mu) * jax.lax.rsqrt(var + eps) * gamma + beta


def _gelu_tanh(x):
    # PyTorch nn.GELU(approximate='tanh')
    c = math.sqrt(2.0 / math.pi)
    return 0.5 * x * (1.0 + jnp.tanh(c * (x + 0.044715 * x * x * x)))


def block_kernel(x_ref,
                 ln1_g_ref, ln1_b_ref,
                 wq_ref, wk_ref, wv_ref,
                 bq_ref, bk_ref, bv_ref,
                 w_pa_ref, b_pa_ref,
                 ln2_g_ref, ln2_b_ref,
                 w_fc_ref, b_fc_ref,
                 w_pm_ref, b_pm_ref,
                 o_ref,
                 *, n_head):
    bf16 = jnp.bfloat16
    f32 = jnp.float32

    x = x_ref[...]                                   # (T, C) f32
    T, C = x.shape
    hd = C // n_head
    scale = 1.0 / math.sqrt(hd)

    # additive causal mask, built once (finite value -> no -inf/NaN edge cases)
    row = jax.lax.broadcasted_iota(jnp.int32, (T, T), 0)
    col = jax.lax.broadcasted_iota(jnp.int32, (T, T), 1)
    mask_bias = jnp.where(col <= row, 0.0, -1e30).astype(f32)      # (T, T)

    # ---------------- attention branch ----------------
    h = _layernorm(x, ln1_g_ref[...], ln1_b_ref[...])              # (T, C) f32
    hb = jnp.broadcast_to(h.astype(bf16)[None], (n_head, T, C))    # (H, T, C) bf16

    # batched per-head projections: (H,T,C) x (H,C,hd) -> (H,T,hd), f32 accum
    q = jnp.einsum('htc,hcd->htd', hb, wq_ref[...],
                   preferred_element_type=f32) + bq_ref[...]
    k = jnp.einsum('htc,hcd->htd', hb, wk_ref[...],
                   preferred_element_type=f32) + bk_ref[...]
    v = jnp.einsum('htc,hcd->htd', hb, wv_ref[...],
                   preferred_element_type=f32) + bv_ref[...]

    # scores: (H,T,hd) x (H,S,hd) -> (H,T,S)
    s = jnp.einsum('hqd,hkd->hqk', q.astype(bf16), k.astype(bf16),
                   preferred_element_type=f32) * scale
    s = s + mask_bias[None]
    s = s - jnp.max(s, axis=-1, keepdims=True)
    p = jnp.exp(s)
    denom = jnp.sum(p, axis=-1, keepdims=True)
    p = p * pl.reciprocal(denom, approx=True)                      # EUP divide

    # attention output: (H,T,S) x (H,S,hd) -> (H,T,hd)
    att = jnp.einsum('hqk,hkd->hqd', p.astype(bf16), v.astype(bf16),
                     preferred_element_type=f32)

    # fused output projection (absorbs the head "concat"):
    # (H,T,hd) x (H,hd,C) -> (H,T,C), then sum over heads
    y = jnp.einsum('htd,hdc->htc', att.astype(bf16), w_pa_ref[...],
                   preferred_element_type=f32)
    y = jnp.sum(y, axis=0) + b_pa_ref[...]                         # (T, C)
    x1 = x + y                                                     # residual 1

    # ---------------- MLP branch ----------------
    h2 = _layernorm(x1, ln2_g_ref[...], ln2_b_ref[...])            # (T, C) f32
    t = jnp.dot(h2.astype(bf16), w_fc_ref[...],
                preferred_element_type=f32) + b_fc_ref[...]        # (T, 4C)
    t = _gelu_tanh(t)
    m = jnp.dot(t.astype(bf16), w_pm_ref[...],
                preferred_element_type=f32) + b_pm_ref[...]        # (T, C)
    o_ref[...] = x1 + m                                            # residual 2


def transformer_block(x, params, n_head):
    (ln1_g, ln1_b, w_qkv, b_qkv, w_pa, b_pa,
     ln2_g, ln2_b, w_fc, b_fc, w_pm, b_pm) = params
    B, T, C = x.shape
    H = n_head
    hd = C // H
    f32, bf16 = jnp.float32, jnp.bfloat16

    # head-major split of the QKV / output-projection weights (done once,
    # outside the kernel); weights go to the kernel in bf16, biases in f32.
    wq = w_qkv[:, 0 * C:1 * C].reshape(C, H, hd).transpose(1, 0, 2).astype(bf16)
    wk = w_qkv[:, 1 * C:2 * C].reshape(C, H, hd).transpose(1, 0, 2).astype(bf16)
    wv = w_qkv[:, 2 * C:3 * C].reshape(C, H, hd).transpose(1, 0, 2).astype(bf16)
    bq = b_qkv[0, 0 * C:1 * C].reshape(H, 1, hd).astype(f32)
    bk = b_qkv[0, 1 * C:2 * C].reshape(H, 1, hd).astype(f32)
    bv = b_qkv[0, 2 * C:3 * C].reshape(H, 1, hd).astype(f32)
    w_pa_h = w_pa.reshape(H, hd, C).astype(bf16)                   # (H, hd, C)

    kern_params = (
        ln1_g.astype(f32), ln1_b.astype(f32),
        wq, wk, wv, bq, bk, bv,
        w_pa_h, b_pa.astype(f32),
        ln2_g.astype(f32), ln2_b.astype(f32),
        w_fc.astype(bf16), b_fc.astype(f32),
        w_pm.astype(bf16), b_pm.astype(f32),
    )

    def const_index_map(ndim):
        return lambda b: (0,) * ndim

    in_specs = [pl.BlockSpec((None, T, C), lambda b: (b, 0, 0))]   # x (squeezed B)
    in_specs += [pl.BlockSpec(p.shape, const_index_map(p.ndim)) for p in kern_params]

    kernel = functools.partial(block_kernel, n_head=n_head)
    return pl.pallas_call(
        kernel,
        out_shape=jax.ShapeDtypeStruct((B, T, C), jnp.float32),
        grid_spec=pltpu.PrefetchScalarGridSpec(
            num_scalar_prefetch=0,
            grid=(B,),
            in_specs=in_specs,
            out_specs=pl.BlockSpec((None, T, C), lambda b: (b, 0, 0)),
        ),
        compiler_params=pltpu.CompilerParams(
            dimension_semantics=("parallel",),
            vmem_limit_bytes=48 * 1024 * 1024,
        ),
    )(x, *kern_params)


# ---------------- pure-JAX reference (f32 everywhere) ----------------
def reference_block(x, params, n_head):
    (ln1_g, ln1_b, w_qkv, b_qkv, w_pa, b_pa,
     ln2_g, ln2_b, w_fc, b_fc, w_pm, b_pm) = params
    B, T, C = x.shape
    hd = C // n_head

    def ln(v, g, b):
        mu = v.mean(-1, keepdims=True)
        var = ((v - mu) ** 2).mean(-1, keepdims=True)
        return (v - mu) / jnp.sqrt(var + 1e-5) * g + b

    h = ln(x, ln1_g, ln1_b)
    qkv = h @ w_qkv + b_qkv
    q, k, v = jnp.split(qkv, 3, axis=-1)
    q = q.reshape(B, T, n_head, hd).transpose(0, 2, 1, 3)
    k = k.reshape(B, T, n_head, hd).transpose(0, 2, 1, 3)
    v = v.reshape(B, T, n_head, hd).transpose(0, 2, 1, 3)
    s = (q @ jnp.swapaxes(k, -2, -1)) / math.sqrt(hd)
    mask = jnp.tril(jnp.ones((T, T), bool))
    s = jnp.where(mask, s, -jnp.inf)
    p = jax.nn.softmax(s, axis=-1)
    y = (p @ v).transpose(0, 2, 1, 3).reshape(B, T, C)
    x = x + (y @ w_pa + b_pa)
    h = ln(x, ln2_g, ln2_b)
    h = h @ w_fc + b_fc
    c = math.sqrt(2.0 / math.pi)
    h = 0.5 * h * (1.0 + jnp.tanh(c * (h + 0.044715 * h ** 3)))
    return x + (h @ w_pm + b_pm)


if __name__ == "__main__":
    B, T, C, n_head = 2, 8, 32, 4
    key = jax.random.PRNGKey(0)
    ks = jax.random.split(key, 10)

    x = jax.random.normal(ks[0], (B, T, C), jnp.float32)

    std = 0.02
    params = (
        1.0 + 0.1 * jax.random.normal(ks[7], (1, C), jnp.float32),      # ln1 gamma
        0.1 * jax.random.normal(ks[8], (1, C), jnp.float32),            # ln1 beta
        std * jax.random.normal(ks[1], (C, 3 * C), jnp.float32),        # c_attn W (in,out)
        std * jax.random.normal(ks[2], (1, 3 * C), jnp.float32),        # c_attn b
        std * jax.random.normal(ks[3], (C, C), jnp.float32),            # attn c_proj W
        jnp.zeros((1, C), jnp.float32),                                 # attn c_proj b
        1.0 + 0.1 * jax.random.normal(ks[9], (1, C), jnp.float32),      # ln2 gamma
        jnp.zeros((1, C), jnp.float32),                                 # ln2 beta
        std * jax.random.normal(ks[4], (C, 4 * C), jnp.float32),        # c_fc W
        std * jax.random.normal(ks[5], (1, 4 * C), jnp.float32),        # c_fc b
        std * jax.random.normal(ks[6], (4 * C, C), jnp.float32),        # mlp c_proj W
        jnp.zeros((1, C), jnp.float32),                                 # mlp c_proj b
    )

    out = transformer_block(x, params, n_head)
    out = jax.block_until_ready(out)

    ref = reference_block(x, params, n_head)
    assert out.shape == (B, T, C)
    # bf16 MXU operands (f32 accumulation) + approx reciprocal -> loosen tol.
    assert jnp.allclose(out, ref, atol=2e-2, rtol=2e-2), float(
        jnp.max(jnp.abs(out - ref)))
    print("KERNEL_OK")
</pallas_src>

<mosaic_0001>
module attributes {stable_mosaic.version = 11 : i64} {
  func.func @block_kernel(%arg0: i32, %arg1: memref<1x8x32xf32, #tpu.memory_space<vmem>>, %arg2: memref<1x32xf32, #tpu.memory_space<vmem>>, %arg3: memref<1x32xf32, #tpu.memory_space<vmem>>, %arg4: memref<4x32x8xbf16, #tpu.memory_space<vmem>>, %arg5: memref<4x32x8xbf16, #tpu.memory_space<vmem>>, %arg6: memref<4x32x8xbf16, #tpu.memory_space<vmem>>, %arg7: memref<4x1x8xf32, #tpu.memory_space<vmem>>, %arg8: memref<4x1x8xf32, #tpu.memory_space<vmem>>, %arg9: memref<4x1x8xf32, #tpu.memory_space<vmem>>, %arg10: memref<4x8x32xbf16, #tpu.memory_space<vmem>>, %arg11: memref<1x32xf32, #tpu.memory_space<vmem>>, %arg12: memref<1x32xf32, #tpu.memory_space<vmem>>, %arg13: memref<1x32xf32, #tpu.memory_space<vmem>>, %arg14: memref<32x128xbf16, #tpu.memory_space<vmem>>, %arg15: memref<1x128xf32, #tpu.memory_space<vmem>>, %arg16: memref<128x32xbf16, #tpu.memory_space<vmem>>, %arg17: memref<1x32xf32, #tpu.memory_space<vmem>>, %arg18: memref<1x8x32xf32, #tpu.memory_space<vmem>>) attributes {dimension_semantics = [#tpu.dimension_semantics<parallel>], iteration_bounds = array<i64: 2>, scalar_prefetch = 0 : i64, scratch_operands = 0 : i64, tpu.core_type = #tpu.core_type<tc>, window_params = [{transform_indices = @transform_0, window_bounds = array<i64: 1, 8, 32>}, {pipeline_mode = #tpu.pipeline_mode<synchronous>, transform_indices = @transform_1, window_bounds = array<i64: 1, 32>}, {pipeline_mode = #tpu.pipeline_mode<synchronous>, transform_indices = @transform_2, window_bounds = array<i64: 1, 32>}, {pipeline_mode = #tpu.pipeline_mode<synchronous>, transform_indices = @transform_3, window_bounds = array<i64: 4, 32, 8>}, {pipeline_mode = #tpu.pipeline_mode<synchronous>, transform_indices = @transform_4, window_bounds = array<i64: 4, 32, 8>}, {pipeline_mode = #tpu.pipeline_mode<synchronous>, transform_indices = @transform_5, window_bounds = array<i64: 4, 32, 8>}, {pipeline_mode = #tpu.pipeline_mode<synchronous>, transform_indices = @transform_6, window_bounds = array<i64: 4, 1, 8>}, {pipeline_mode = #tpu.pipeline_mode<synchronous>, transform_indices = @transform_7, window_bounds = array<i64: 4, 1, 8>}, {pipeline_mode = #tpu.pipeline_mode<synchronous>, transform_indices = @transform_8, window_bounds = array<i64: 4, 1, 8>}, {pipeline_mode = #tpu.pipeline_mode<synchronous>, transform_indices = @transform_9, window_bounds = array<i64: 4, 8, 32>}, {pipeline_mode = #tpu.pipeline_mode<synchronous>, transform_indices = @transform_10, window_bounds = array<i64: 1, 32>}, {pipeline_mode = #tpu.pipeline_mode<synchronous>, transform_indices = @transform_11, window_bounds = array<i64: 1, 32>}, {pipeline_mode = #tpu.pipeline_mode<synchronous>, transform_indices = @transform_12, window_bounds = array<i64: 1, 32>}, {pipeline_mode = #tpu.pipeline_mode<synchronous>, transform_indices = @transform_13, window_bounds = array<i64: 32, 128>}, {pipeline_mode = #tpu.pipeline_mode<synchronous>, transform_indices = @transform_14, window_bounds = array<i64: 1, 128>}, {pipeline_mode = #tpu.pipeline_mode<synchronous>, transform_indices = @transform_15, window_bounds = array<i64: 128, 32>}, {pipeline_mode = #tpu.pipeline_mode<synchronous>, transform_indices = @transform_16, window_bounds = array<i64: 1, 32>}, {transform_indices = @transform_17, window_bounds = array<i64: 1, 8, 32>}]} {
    %c0 = arith.constant 0 : index
    %c0_0 = arith.constant 0 : index
    %c0_1 = arith.constant 0 : index
    %0 = vector.load %arg1[%c0, %c0_0, %c0_1] : memref<1x8x32xf32, #tpu.memory_space<vmem>>, vector<1x8x32xf32>
    %1 = vector.shape_cast %0 : vector<1x8x32xf32> to vector<8x32xf32>
    %2 = tpu.iota {dimensions = array<i32: 0>} : vector<8x8xi32>
    %3 = tpu.iota {dimensions = array<i32: 1>} : vector<8x8xi32>
    %4 = arith.cmpi sle, %3, %2 : vector<8x8xi32>
    %cst = arith.constant 0.000000e+00 : f32
    %cst_2 = arith.constant -1.000000e+30 : f32
    %5 = vector.broadcast %cst : f32 to vector<8x8xf32>
    %6 = vector.broadcast %cst_2 : f32 to vector<8x8xf32>
    %7 = arith.select %4, %5, %6 : vector<8x8xi1>, vector<8x8xf32>
    %c0_3 = arith.constant 0 : index
    %c0_4 = arith.constant 0 : index
    %8 = vector.load %arg2[%c0_3, %c0_4] : memref<1x32xf32, #tpu.memory_space<vmem>>, vector<1x32xf32>
    %c0_5 = arith.constant 0 : index
    %c0_6 = arith.constant 0 : index
    %9 = vector.load %arg3[%c0_5, %c0_6] : memref<1x32xf32, #tpu.memory_space<vmem>>, vector<1x32xf32>
    %cst_7 = arith.constant dense<0.000000e+00> : vector<8xf32>
    %10 = vector.multi_reduction <add>, %1, %cst_7 [1] : vector<8x32xf32> to vector<8xf32>
    %11 = vector.shape_cast %10 : vector<8xf32> to vector<8x1xf32>
    %cst_8 = arith.constant 3.200000e+01 : f32
    %12 = vector.broadcast %cst_8 : f32 to vector<8x1xf32>
    %13 = arith.divf %11, %12 : vector<8x1xf32>
    %14 = vector.broadcast %13 : vector<8x1xf32> to vector<8x32xf32>
    %15 = arith.subf %1, %14 : vector<8x32xf32>
    %16 = arith.mulf %15, %15 : vector<8x32xf32>
    %cst_9 = arith.constant dense<0.000000e+00> : vector<8xf32>
    %17 = vector.multi_reduction <add>, %16, %cst_9 [1] : vector<8x32xf32> to vector<8xf32>
    %18 = vector.shape_cast %17 : vector<8xf32> to vector<8x1xf32>
    %cst_10 = arith.constant 3.200000e+01 : f32
    %19 = vector.broadcast %cst_10 : f32 to vector<8x1xf32>
    %20 = arith.divf %18, %19 : vector<8x1xf32>
    %21 = vector.broadcast %13 : vector<8x1xf32> to vector<8x32xf32>
    %22 = arith.subf %1, %21 : vector<8x32xf32>
    %cst_11 = arith.constant 9.99999974E-6 : f32
    %23 = vector.broadcast %cst_11 : f32 to vector<8x1xf32>
    %24 = arith.addf %20, %23 : vector<8x1xf32>
    %25 = math.rsqrt %24 : vector<8x1xf32>
    %26 = vector.broadcast %25 : vector<8x1xf32> to vector<8x32xf32>
    %27 = arith.mulf %22, %26 : vector<8x32xf32>
    %28 = vector.broadcast %8 : vector<1x32xf32> to vector<8x32xf32>
    %29 = arith.mulf %27, %28 : vector<8x32xf32>
    %30 = vector.broadcast %9 : vector<1x32xf32> to vector<8x32xf32>
    %31 = arith.addf %29, %30 : vector<8x32xf32>
    %32 = arith.truncf %31 : vector<8x32xf32> to vector<8x32xbf16>
    %33 = vector.shape_cast %32 : vector<8x32xbf16> to vector<1x8x32xbf16>
    %34 = vector.shape_cast %33 : vector<1x8x32xbf16> to vector<1x8x32xbf16>
    %35 = vector.broadcast %34 : vector<1x8x32xbf16> to vector<4x8x32xbf16>
    %c0_12 = arith.constant 0 : index
    %c0_13 = arith.constant 0 : index
    %c0_14 = arith.constant 0 : index
    %36 = vector.load %arg4[%c0_12, %c0_13, %c0_14] : memref<4x32x8xbf16, #tpu.memory_space<vmem>>, vector<4x32x8xbf16>
    "tpu.trace_start"() <{level = 10 : i32, message = "htc,hcd->htd"}> : () -> ()
    %cst_15 = arith.constant dense<0.000000e+00> : vector<4x8x8xf32>
    %37 = tpu.matmul %35, %36, %cst_15 {dimension_numbers = #tpu.dot_dimension_numbers<[2], [1], [1], [2], [0, 0, 0, 1, 1, 2], [0], [0]>} : vector<4x8x32xbf16>, vector<4x32x8xbf16>, vector<4x8x8xf32> -> vector<4x8x8xf32>
    "tpu.trace_stop"() : () -> ()
    %c0_16 = arith.constant 0 : index
    %c0_17 = arith.constant 0 : index
    %c0_18 = arith.constant 0 : index
    %38 = vector.load %arg7[%c0_16, %c0_17, %c0_18] : memref<4x1x8xf32, #tpu.memory_space<vmem>>, vector<4x1x8xf32>
    %39 = vector.broadcast %38 : vector<4x1x8xf32> to vector<4x8x8xf32>
    %40 = arith.addf %37, %39 : vector<4x8x8xf32>
    %c0_19 = arith.constant 0 : index
    %c0_20 = arith.constant 0 : index
    %c0_21 = arith.constant 0 : index
    %41 = vector.load %arg5[%c0_19, %c0_20, %c0_21] : memref<4x32x8xbf16, #tpu.memory_space<vmem>>, vector<4x32x8xbf16>
    "tpu.trace_start"() <{level = 10 : i32, message = "htc,hcd->htd"}> : () -> ()
    %cst_22 = arith.constant dense<0.000000e+00> : vector<4x8x8xf32>
    %42 = tpu.matmul %35, %41, %cst_22 {dimension_numbers = #tpu.dot_dimension_numbers<[2], [1], [1], [2], [0, 0, 0, 1, 1, 2], [0], [0]>} : vector<4x8x32xbf16>, vector<4x32x8xbf16>, vector<4x8x8xf32> -> vector<4x8x8xf32>
    "tpu.trace_stop"() : () -> ()
    %c0_23 = arith.constant 0 : index
    %c0_24 = arith.constant 0 : index
    %c0_25 = arith.constant 0 : index
    %43 = vector.load %arg8[%c0_23, %c0_24, %c0_25] : memref<4x1x8xf32, #tpu.memory_space<vmem>>, vector<4x1x8xf32>
    %44 = vector.broadcast %43 : vector<4x1x8xf32> to vector<4x8x8xf32>
    %45 = arith.addf %42, %44 : vector<4x8x8xf32>
    %c0_26 = arith.constant 0 : index
    %c0_27 = arith.constant 0 : index
    %c0_28 = arith.constant 0 : index
    %46 = vector.load %arg6[%c0_26, %c0_27, %c0_28] : memref<4x32x8xbf16, #tpu.memory_space<vmem>>, vector<4x32x8xbf16>
    "tpu.trace_start"() <{level = 10 : i32, message = "htc,hcd->htd"}> : () -> ()
    %cst_29 = arith.constant dense<0.000000e+00> : vector<4x8x8xf32>
    %47 = tpu.matmul %35, %46, %cst_29 {dimension_numbers = #tpu.dot_dimension_numbers<[2], [1], [1], [2], [0, 0, 0, 1, 1, 2], [0], [0]>} : vector<4x8x32xbf16>, vector<4x32x8xbf16>, vector<4x8x8xf32> -> vector<4x8x8xf32>
    "tpu.trace_stop"() : () -> ()
    %c0_30 = arith.constant 0 : index
    %c0_31 = arith.constant 0 : index
    %c0_32 = arith.constant 0 : index
    %48 = vector.load %arg9[%c0_30, %c0_31, %c0_32] : memref<4x1x8xf32, #tpu.memory_space<vmem>>, vector<4x1x8xf32>
    %49 = vector.broadcast %48 : vector<4x1x8xf32> to vector<4x8x8xf32>
    %50 = arith.addf %47, %49 : vector<4x8x8xf32>
    %51 = arith.truncf %40 : vector<4x8x8xf32> to vector<4x8x8xbf16>
    %52 = arith.truncf %45 : vector<4x8x8xf32> to vector<4x8x8xbf16>
    "tpu.trace_start"() <{level = 10 : i32, message = "hqd,hkd->hqk"}> : () -> ()
    %cst_33 = arith.constant dense<0.000000e+00> : vector<4x8x8xf32>
    %53 = tpu.matmul %51, %52, %cst_33 {dimension_numbers = #tpu.dot_dimension_numbers<[2], [2], [1], [1], [0, 0, 0, 1, 1, 1], [0], [0]>} : vector<4x8x8xbf16>, vector<4x8x8xbf16>, vector<4x8x8xf32> -> vector<4x8x8xf32>
    "tpu.trace_stop"() : () -> ()
    %cst_34 = arith.constant 0.353553385 : f32
    %54 = vector.broadcast %cst_34 : f32 to vector<4x8x8xf32>
    %55 = arith.mulf %53, %54 : vector<4x8x8xf32>
    %56 = vector.shape_cast %7 : vector<8x8xf32> to vector<1x8x8xf32>
    %57 = vector.broadcast %56 : vector<1x8x8xf32> to vector<4x8x8xf32>
    %58 = arith.addf %55, %57 : vector<4x8x8xf32>
    %cst_35 = arith.constant dense<0xFF800000> : vector<4x8xf32>
    %59 = vector.multi_reduction <maximumf>, %58, %cst_35 [2] : vector<4x8x8xf32> to vector<4x8xf32>
    %60 = vector.shape_cast %59 : vector<4x8xf32> to vector<4x8x1xf32>
    %61 = vector.broadcast %60 : vector<4x8x1xf32> to vector<4x8x8xf32>
    %62 = arith.subf %58, %61 : vector<4x8x8xf32>
    %63 = math.exp %62 : vector<4x8x8xf32>
    %cst_36 = arith.constant dense<0.000000e+00> : vector<4x8xf32>
    %64 = vector.multi_reduction <add>, %63, %cst_36 [2] : vector<4x8x8xf32> to vector<4x8xf32>
    %65 = vector.shape_cast %64 : vector<4x8xf32> to vector<4x8x1xf32>
    %66 = tpu.reciprocal %65 {approx = true} : vector<4x8x1xf32> -> vector<4x8x1xf32>
    %67 = vector.broadcast %66 : vector<4x8x1xf32> to vector<4x8x8xf32>
    %68 = arith.mulf %63, %67 : vector<4x8x8xf32>
    %69 = arith.truncf %68 : vector<4x8x8xf32> to vector<4x8x8xbf16>
    %70 = arith.truncf %50 : vector<4x8x8xf32> to vector<4x8x8xbf16>
    "tpu.trace_start"() <{level = 10 : i32, message = "hqk,hkd->hqd"}> : () -> ()
    %cst_37 = arith.constant dense<0.000000e+00> : vector<4x8x8xf32>
    %71 = tpu.matmul %69, %70, %cst_37 {dimension_numbers = #tpu.dot_dimension_numbers<[2], [1], [1], [2], [0, 0, 0, 1, 1, 2], [0], [0]>} : vector<4x8x8xbf16>, vector<4x8x8xbf16>, vector<4x8x8xf32> -> vector<4x8x8xf32>
    "tpu.trace_stop"() : () -> ()
    %72 = arith.truncf %71 : vector<4x8x8xf32> to vector<4x8x8xbf16>
    %c0_38 = arith.constant 0 : index
    %c0_39 = arith.constant 0 : index
    %c0_40 = arith.constant 0 : index
    %73 = vector.load %arg10[%c0_38, %c0_39, %c0_40] : memref<4x8x32xbf16, #tpu.memory_space<vmem>>, vector<4x8x32xbf16>
    "tpu.trace_start"() <{level = 10 : i32, message = "htd,hdc->htc"}> : () -> ()
    %cst_41 = arith.constant dense<0.000000e+00> : vector<4x8x32xf32>
    %74 = tpu.matmul %72, %73, %cst_41 {dimension_numbers = #tpu.dot_dimension_numbers<[2], [1], [1], [2], [0, 0, 0, 1, 1, 2], [0], [0]>} : vector<4x8x8xbf16>, vector<4x8x32xbf16>, vector<4x8x32xf32> -> vector<4x8x32xf32>
    "tpu.trace_stop"() : () -> ()
    %cst_42 = arith.constant dense<0.000000e+00> : vector<8x32xf32>
    %75 = vector.multi_reduction <add>, %74, %cst_42 [0] : vector<4x8x32xf32> to vector<8x32xf32>
    %c0_43 = arith.constant 0 : index
    %c0_44 = arith.constant 0 : index
    %76 = vector.load %arg11[%c0_43, %c0_44] : memref<1x32xf32, #tpu.memory_space<vmem>>, vector<1x32xf32>
    %77 = vector.broadcast %76 : vector<1x32xf32> to vector<8x32xf32>
    %78 = arith.addf %75, %77 : vector<8x32xf32>
    %79 = arith.addf %1, %78 : vector<8x32xf32>
    %c0_45 = arith.constant 0 : index
    %c0_46 = arith.constant 0 : index
    %80 = vector.load %arg12[%c0_45, %c0_46] : memref<1x32xf32, #tpu.memory_space<vmem>>, vector<1x32xf32>
    %c0_47 = arith.constant 0 : index
    %c0_48 = arith.constant 0 : index
    %81 = vector.load %arg13[%c0_47, %c0_48] : memref<1x32xf32, #tpu.memory_space<vmem>>, vector<1x32xf32>
    %cst_49 = arith.constant dense<0.000000e+00> : vector<8xf32>
    %82 = vector.multi_reduction <add>, %79, %cst_49 [1] : vector<8x32xf32> to vector<8xf32>
    %83 = vector.shape_cast %82 : vector<8xf32> to vector<8x1xf32>
    %cst_50 = arith.constant 3.200000e+01 : f32
    %84 = vector.broadcast %cst_50 : f32 to vector<8x1xf32>
    %85 = arith.divf %83, %84 : vector<8x1xf32>
    %86 = vector.broadcast %85 : vector<8x1xf32> to vector<8x32xf32>
    %87 = arith.subf %79, %86 : vector<8x32xf32>
    %88 = arith.mulf %87, %87 : vector<8x32xf32>
    %cst_51 = arith.constant dense<0.000000e+00> : vector<8xf32>
    %89 = vector.multi_reduction <add>, %88, %cst_51 [1] : vector<8x32xf32> to vector<8xf32>
    %90 = vector.shape_cast %89 : vector<8xf32> to vector<8x1xf32>
    %cst_52 = arith.constant 3.200000e+01 : f32
    %91 = vector.broadcast %cst_52 : f32 to vector<8x1xf32>
    %92 = arith.divf %90, %91 : vector<8x1xf32>
    %93 = vector.broadcast %85 : vector<8x1xf32> to vector<8x32xf32>
    %94 = arith.subf %79, %93 : vector<8x32xf32>
    %cst_53 = arith.constant 9.99999974E-6 : f32
    %95 = vector.broadcast %cst_53 : f32 to vector<8x1xf32>
    %96 = arith.addf %92, %95 : vector<8x1xf32>
    %97 = math.rsqrt %96 : vector<8x1xf32>
    %98 = vector.broadcast %97 : vector<8x1xf32> to vector<8x32xf32>
    %99 = arith.mulf %94, %98 : vector<8x32xf32>
    %100 = vector.broadcast %80 : vector<1x32xf32> to vector<8x32xf32>
    %101 = arith.mulf %99, %100 : vector<8x32xf32>
    %102 = vector.broadcast %81 : vector<1x32xf32> to vector<8x32xf32>
    %103 = arith.addf %101, %102 : vector<8x32xf32>
    %104 = arith.truncf %103 : vector<8x32xf32> to vector<8x32xbf16>
    %c0_54 = arith.constant 0 : index
    %c0_55 = arith.constant 0 : index
    %105 = vector.load %arg14[%c0_54, %c0_55] : memref<32x128xbf16, #tpu.memory_space<vmem>>, vector<32x128xbf16>
    %cst_56 = arith.constant dense<0.000000e+00> : vector<8x128xf32>
    %106 = tpu.matmul %104, %105, %cst_56 {dimension_numbers = #tpu.dot_dimension_numbers<[1], [0], [0], [1], [0, 0, 1, 1], [], []>} : vector<8x32xbf16>, vector<32x128xbf16>, vector<8x128xf32> -> vector<8x128xf32>
    %c0_57 = arith.constant 0 : index
    %c0_58 = arith.constant 0 : index
    %107 = vector.load %arg15[%c0_57, %c0_58] : memref<1x128xf32, #tpu.memory_space<vmem>>, vector<1x128xf32>
    %108 = vector.broadcast %107 : vector<1x128xf32> to vector<8x128xf32>
    %109 = arith.addf %106, %108 : vector<8x128xf32>
    %cst_59 = arith.constant 5.000000e-01 : f32
    %110 = vector.broadcast %cst_59 : f32 to vector<8x128xf32>
    %111 = arith.mulf %110, %109 : vector<8x128xf32>
    %cst_60 = arith.constant 4.471500e-02 : f32
    %112 = vector.broadcast %cst_60 : f32 to vector<8x128xf32>
    %113 = arith.mulf %112, %109 : vector<8x128xf32>
    %114 = arith.mulf %113, %109 : vector<8x128xf32>
    %115 = arith.mulf %114, %109 : vector<8x128xf32>
    %116 = arith.addf %109, %115 : vector<8x128xf32>
    %cst_61 = arith.constant 0.797884583 : f32
    %117 = vector.broadcast %cst_61 : f32 to vector<8x128xf32>
    %118 = arith.mulf %117, %116 : vector<8x128xf32>
    %119 = math.tanh %118 : vector<8x128xf32>
    %cst_62 = arith.constant 1.000000e+00 : f32
    %120 = vector.broadcast %cst_62 : f32 to vector<8x128xf32>
    %121 = arith.addf %120, %119 : vector<8x128xf32>
    %122 = arith.mulf %111, %121 : vector<8x128xf32>
    %123 = arith.truncf %122 : vector<8x128xf32> to vector<8x128xbf16>
    %c0_63 = arith.constant 0 : index
    %c0_64 = arith.constant 0 : index
    %124 = vector.load %arg16[%c0_63, %c0_64] : memref<128x32xbf16, #tpu.memory_space<vmem>>, vector<128x32xbf16>
    %cst_65 = arith.constant dense<0.000000e+00> : vector<8x32xf32>
    %125 = tpu.matmul %123, %124, %cst_65 {dimension_numbers = #tpu.dot_dimension_numbers<[1], [0], [0], [1], [0, 0, 1, 1], [], []>} : vector<8x128xbf16>, vector<128x32xbf16>, vector<8x32xf32> -> vector<8x32xf32>
    %c0_66 = arith.constant 0 : index
    %c0_67 = arith.constant 0 : index
    %126 = vector.load %arg17[%c0_66, %c0_67] : memref<1x32xf32, #tpu.memory_space<vmem>>, vector<1x32xf32>
    %127 = vector.broadcast %126 : vector<1x32xf32> to vector<8x32xf32>
    %128 = arith.addf %125, %127 : vector<8x32xf32>
    %129 = arith.addf %79, %128 : vector<8x32xf32>
    %c0_68 = arith.constant 0 : index
    %c0_69 = arith.constant 0 : index
    %c0_70 = arith.constant 0 : index
    %130 = vector.load %arg18[%c0_68, %c0_69, %c0_70] : memref<1x8x32xf32, #tpu.memory_space<vmem>>, vector<1x8x32xf32>
    %131 = vector.shape_cast %130 : vector<1x8x32xf32> to vector<8x32xf32>
    %132 = vector.shape_cast %129 : vector<8x32xf32> to vector<1x8x32xf32>
    tpu.vector_store %arg18[%c0_68, %c0_69, %c0_70], %132 {strides = array<i32>} : memref<1x8x32xf32, #tpu.memory_space<vmem>>, vector<1x8x32xf32>,
    return
  }
  func.func @transform_0(%arg0: i32) -> (i32, i32, i32) {
    %c0_i32 = arith.constant 0 : i32
    %c0_i32_0 = arith.constant 0 : i32
    %c0_i32_1 = arith.constant 0 : i32
    return %arg0, %c0_i32, %c0_i32_0 : i32, i32, i32
  }
  func.func @transform_1(%arg0: i32) -> (i32, i32) {
    %c0_i32 = arith.constant 0 : i32
    %c0_i32_0 = arith.constant 0 : i32
    %c0_i32_1 = arith.constant 0 : i32
    return %c0_i32, %c0_i32_0 : i32, i32
  }
  func.func @transform_2(%arg0: i32) -> (i32, i32) {
    %c0_i32 = arith.constant 0 : i32
    %c0_i32_0 = arith.constant 0 : i32
    %c0_i32_1 = arith.constant 0 : i32
    return %c0_i32, %c0_i32_0 : i32, i32
  }
  func.func @transform_3(%arg0: i32) -> (i32, i32, i32) {
    %c0_i32 = arith.constant 0 : i32
    %c0_i32_0 = arith.constant 0 : i32
    %c0_i32_1 = arith.constant 0 : i32
    %c0_i32_2 = arith.constant 0 : i32
    return %c0_i32, %c0_i32_0, %c0_i32_1 : i32, i32, i32
  }
  func.func @transform_4(%arg0: i32) -> (i32, i32, i32) {
    %c0_i32 = arith.constant 0 : i32
    %c0_i32_0 = arith.constant 0 : i32
    %c0_i32_1 = arith.constant 0 : i32
    %c0_i32_2 = arith.constant 0 : i32
    return %c0_i32, %c0_i32_0, %c0_i32_1 : i32, i32, i32
  }
  func.func @transform_5(%arg0: i32) -> (i32, i32, i32) {
    %c0_i32 = arith.constant 0 : i32
    %c0_i32_0 = arith.constant 0 : i32
    %c0_i32_1 = arith.constant 0 : i32
    %c0_i32_2 = arith.constant 0 : i32
    return %c0_i32, %c0_i32_0, %c0_i32_1 : i32, i32, i32
  }
  func.func @transform_6(%arg0: i32) -> (i32, i32, i32) {
    %c0_i32 = arith.constant 0 : i32
    %c0_i32_0 = arith.constant 0 : i32
    %c0_i32_1 = arith.constant 0 : i32
    %c0_i32_2 = arith.constant 0 : i32
    return %c0_i32, %c0_i32_0, %c0_i32_1 : i32, i32, i32
  }
  func.func @transform_7(%arg0: i32) -> (i32, i32, i32) {
    %c0_i32 = arith.constant 0 : i32
    %c0_i32_0 = arith.constant 0 : i32
    %c0_i32_1 = arith.constant 0 : i32
    %c0_i32_2 = arith.constant 0 : i32
    return %c0_i32, %c0_i32_0, %c0_i32_1 : i32, i32, i32
  }
  func.func @transform_8(%arg0: i32) -> (i32, i32, i32) {
    %c0_i32 = arith.constant 0 : i32
    %c0_i32_0 = arith.constant 0 : i32
    %c0_i32_1 = arith.constant 0 : i32
    %c0_i32_2 = arith.constant 0 : i32
    return %c0_i32, %c0_i32_0, %c0_i32_1 : i32, i32, i32
  }
  func.func @transform_9(%arg0: i32) -> (i32, i32, i32) {
    %c0_i32 = arith.constant 0 : i32
    %c0_i32_0 = arith.constant 0 : i32
    %c0_i32_1 = arith.constant 0 : i32
    %c0_i32_2 = arith.constant 0 : i32
    return %c0_i32, %c0_i32_0, %c0_i32_1 : i32, i32, i32
  }
  func.func @transform_10(%arg0: i32) -> (i32, i32) {
    %c0_i32 = arith.constant 0 : i32
    %c0_i32_0 = arith.constant 0 : i32
    %c0_i32_1 = arith.constant 0 : i32
    return %c0_i32, %c0_i32_0 : i32, i32
  }
  func.func @transform_11(%arg0: i32) -> (i32, i32) {
    %c0_i32 = arith.constant 0 : i32
    %c0_i32_0 = arith.constant 0 : i32
    %c0_i32_1 = arith.constant 0 : i32
    return %c0_i32, %c0_i32_0 : i32, i32
  }
  func.func @transform_12(%arg0: i32) -> (i32, i32) {
    %c0_i32 = arith.constant 0 : i32
    %c0_i32_0 = arith.constant 0 : i32
    %c0_i32_1 = arith.constant 0 : i32
    return %c0_i32, %c0_i32_0 : i32, i32
  }
  func.func @transform_13(%arg0: i32) -> (i32, i32) {
    %c0_i32 = arith.constant 0 : i32
    %c0_i32_0 = arith.constant 0 : i32
    %c0_i32_1 = arith.constant 0 : i32
    return %c0_i32, %c0_i32_0 : i32, i32
  }
  func.func @transform_14(%arg0: i32) -> (i32, i32) {
    %c0_i32 = arith.constant 0 : i32
    %c0_i32_0 = arith.constant 0 : i32
    %c0_i32_1 = arith.constant 0 : i32
    return %c0_i32, %c0_i32_0 : i32, i32
  }
  func.func @transform_15(%arg0: i32) -> (i32, i32) {
    %c0_i32 = arith.constant 0 : i32
    %c0_i32_0 = arith.constant 0 : i32
    %c0_i32_1 = arith.constant 0 : i32
    return %c0_i32, %c0_i32_0 : i32, i32
  }
  func.func @transform_16(%arg0: i32) -> (i32, i32) {
    %c0_i32 = arith.constant 0 : i32
    %c0_i32_0 = arith.constant 0 : i32
    %c0_i32_1 = arith.constant 0 : i32
    return %c0_i32, %c0_i32_0 : i32, i32
  }
  func.func @transform_17(%arg0: i32) -> (i32, i32, i32) {
    %c0_i32 = arith.constant 0 : i32
    %c0_i32_0 = arith.constant 0 : i32
    %c0_i32_1 = arith.constant 0 : i32
    return %arg0, %c0_i32, %c0_i32_0 : i32, i32, i32
  }
}

</mosaic_0001>

<bundles_post_ra>
// kernel: tpu_custom_call.1
= control target key start
LH: loop header
LB: loop body
LE: loop exit
PB: predicated region body
PF: predicated region fallthrough
CT: control target
= control target key end

     0   :  { %s2319_s0 = inlined_call_operand.vmem [shape: f32[2,8,32], index: 0, kind: input, shape index: {}]   ;;  %s2320_s1 = inlined_call_operand.vmem [shape: f32[1,32], index: 1, kind: input, shape index: {}]   ;;  %s2321_s2 = inlined_call_operand.vmem [shape: f32[1,32], index: 2, kind: input, shape index: {}]   ;;  %s2322_s3 = inlined_call_operand.vmem [shape: bf16[4,32,8], index: 3, kind: input, shape index: {}]   ;;  %s2323_s4 = inlined_call_operand.vmem [shape: bf16[4,32,8], index: 4, kind: input, shape index: {}]   ;;  %s2324_s5 = inlined_call_operand.vmem [shape: bf16[4,32,8], index: 5, kind: input, shape index: {}]   ;;  %s2325_s6 = inlined_call_operand.vmem [shape: f32[4,1,8], index: 6, kind: input, shape index: {}]   ;;  %s2326_s7 = inlined_call_operand.vmem [shape: f32[4,1,8], index: 7, kind: input, shape index: {}]   ;;  %s2327_s8 = inlined_call_operand.vmem [shape: f32[4,1,8], index: 8, kind: input, shape index: {}]   ;;  %s2328_s9 = inlined_call_operand.vmem [shape: bf16[4,8,32], index: 9, kind: input, shape index: {}]   ;;  %s2329_s10 = inlined_call_operand.vmem [shape: f32[1,32], index: 10, kind: input, shape index: {}]   ;;  %s2330_s11 = inlined_call_operand.vmem [shape: f32[1,32], index: 11, kind: input, shape index: {}]   ;;  %s2331_s12 = inlined_call_operand.vmem [shape: f32[1,32], index: 12, kind: input, shape index: {}]   ;;  %s2332_s13 = inlined_call_operand.vmem [shape: bf16[32,128], index: 13, kind: input, shape index: {}]   ;;  %s2333_s14 = inlined_call_operand.vmem [shape: f32[1,128], index: 14, kind: input, shape index: {}]   ;;  %s2334_s15 = inlined_call_operand.vmem [shape: bf16[128,32], index: 15, kind: input, shape index: {}]   ;;  %s2335_s16 = inlined_call_operand.vmem [shape: f32[1,32], index: 16, kind: input, shape index: {}]   ;;  %s2336_s17 = inlined_call_operand.hbm [shape: f32[2,8,32], index: 17, kind: output, shape index: {}]  }
   0x1   :  { %2341 = sst [smem:[#allocation9_spill]] %s2319_s0 }
   0x2   :  { %2342 = sst [smem:[#allocation10_spill]] %s2320_s1 }
   0x3   :  { %2343 = sst [smem:[#allocation11_spill]] %s2321_s2 }
   0x4   :  { %2344 = sst [smem:[#allocation12_spill]] %s2322_s3 }
   0x5   :  { %22 = vsyncpa [#allocation3], 0 }
   0x6   :  { %24 = vsyncpa [#allocation3 + $0x1], 0  ;;  %s1993_s24 = smov 0   ;;  %s1995_s25 = smov 0  }
   0x7   :  { %s1997_s26 = smov 0   ;;  %s1999_s27 = smov 0  }
   0x8 LB: > { %2345 = sst [smem:[#allocation5_spill]] %s1895_s26  ;;  %s2014_s28 = sadd.s32 4294967295, %s1899_s27   ;;  %s1899_s27 = sphi %s1999_s27, %s2356_s27   ;;  %s1895_s26 = sphi %s1997_s26, %s2358_s26   ;;  %s1891_s25 = sphi %s1995_s25, %s2360_s25   ;;  %s1887_s24 = sphi %s1993_s24, %s2359_s24  }
   0x9   : > { %s1548_s29 = sadd.s32 4294967294, %s1899_s27   ;;  %s2018_s0 = sadd.s32 1, %s1899_s27  }
   0xa   : > { %2346 = sst [smem:[#allocation6_spill]] %s2018_s0  ;;  %s399_s30 = sadd.s32 1, %s1895_s26 }
   0xb   : > { %s396_s18 = ssub.s32 %s1899_s27, %s2018_s0  ;;  %p409_p0 = scmp.ne.s32.totalorder %s1895_s26, %s1891_s25 }
   0xc   : > { %p397_p1 = scmp.eq.s32.totalorder %s396_s18, 0  ;;  %p410_p2 = scmp.eq.s32.totalorder %s2014_s28, 1 }
   0xd   : > { %p415_p3 = scmp.ne.s32.totalorder %s1891_s25, %s1887_s24  ;;  %p416_p4 = scmp.eq.s32.totalorder %s1548_s29, 1 }
   0xe   : > { %s2029_s19 = scalar_select %p397_p1, %s1895_s26, %s399_s30  }
   0xf   : > { %p2031_p5 = por %p410_p2, %p409_p0  ;;  %p2035_p6 = por %p416_p4, %p415_p3 }
  0x10   : > { %2347 = sst [smem:[#allocation7_spill]] %s2029_s19  ;;  %p1551_p7 = scmp.ge.s32.totalorder %s1899_s27, 1 }
  0x11   : > { %s2349_s20 = scalar_select %p2035_p6, 1, 0 }
  0x12   : > { %p489_p8 = scmp.lt.s32.totalorder %s1899_s27, 3 }
  0x13   : > { %2350 = sst [smem:[#allocation8_spill]] %s2349_s20 }
  0x14   : > { %p490_p9 = pnand %p1551_p7, %p489_p8 }
  0x15   : > { %p540_p10 = scmp.lt.s32.totalorder (!%p490_p9), %s2014_s28, 1  ;;  %s2351_s30 = sld [smem:[#allocation9_spill]] (!%p490_p9) }
  0x16   : > { %493 = sbr.rel (%p490_p9) target bundleno = 1706 (0x6aa), region = 88  ;;  %s2352_s3 = sld [smem:[#allocation12_spill]] (!%p490_p9) }
  0x17   : > { %s2354_s2 = sld [smem:[#allocation11_spill]] (!%p490_p9)  ;;  %s537_s29 = sand.u32 (!%p490_p9), 1, %s1891_s25  }
  0x1b   : > { %s541_s21 = scalar_select %p540_p10, %s2014_s28, 1  ;;  %vm554_vm0 = vcmask 261120   ;;  %v1901_v2 = vmov 32.0   ;;  %v1730_v17 = vld [vmem:[%s2323_s4 + $0x18] sm:$0xff]  ;;  %v1729_v21 = vld [vmem:[%s2323_s4 + $0x10] sm:$0xff]  ;;  %v1728_v24 = vld [vmem:[%s2323_s4 + $0x8] sm:$0xff] }
  0x1c   : > { %1813 = vrcp.f32 %v1901_v2  ;;  %v1720_v14 = vld [vmem:[%s2352_s3 + $0x8] sm:$0xff]  ;;  %v1722_v15 = vld [vmem:[%s2352_s3 + $0x18] sm:$0xff]  ;;  %803 = vmatpush.bf16.msra.mxu1 %v1730_v17  ;;  %v1719_v18 = vld [vmem:[%s2352_s3] sm:$0xff]  ;;  %vm1000_vm5 = vcmask 64512   ;;  %vm1140_vm6 = vcmask 1043456  }
  0x1d   : > { %s1553_s22 = sshll.u32 %s541_s21, 3  ;;  %v1726_v16 = vld [vmem:[%s2352_s3 + $0x38] sm:$0xff]  ;;  %646 = vmatpush.bf16.msra.mxu0 %v1720_v14  ;;  %671 = vmatpush.bf16.msra.mxu2 %v1722_v15  ;;  %v1721_v19 = vld [vmem:[%s2352_s3 + $0x10] sm:$0xff]  ;;  %v1724_v23 = vld [vmem:[%s2352_s3 + $0x28] sm:$0xff] }
  0x1e   : > { %s543_s18 = scalar_lea.vmem %s2351_s30, %s1553_s22  ;;  %721 = vmatpush.bf16.msra.mxu3 %v1726_v16  ;;  %v1725_v20 = vld [vmem:[%s2352_s3 + $0x30] sm:$0xff]  ;;  %v1734_v25 = vld [vmem:[%s2323_s4 + $0x38] sm:$0xff]  ;;  %v1723_v28 = vld [vmem:[%s2352_s3 + $0x20] sm:$0xff]  ;;  %s2353_s30 = sld [smem:[#allocation10_spill]] }
  0x1f   : > { %v2046_v0 = vld [vmem:[%s543_s18] sm:$0xff]  ;;  %v1738_v27 = vld [vmem:[%s2324_s5 + $0x18] sm:$0xff]  ;;  %v1733_v31 = vld [vmem:[%s2323_s4 + $0x30] sm:$0xff]  ;;  %s1716_s18 = sshll.u32 %s2014_s28, 3  ;;  %s1474_s28 = scalar_lea.sflag [#allocation3], %s537_s29 }
  0x20   : > { %v555_v1 = vsel %vm554_vm0, %v2046_v0, 0.0  ;;  %804 = vmatpush.bf16.msra.mxu1 %v1729_v21  ;;  %v1727_v29 = vld [vmem:[%s2323_s4] sm:$0xff]  ;;  %v1737_v32 = vld [vmem:[%s2324_s5 + $0x10] sm:$0xff]  ;;  %v1732_v46 = vld [vmem:[%s2323_s4 + $0x28] sm:$0xff]  ;;  %s1484_s21 = scalar_lea.hbm %s2336_s17, %s1716_s18 }
  0x21   : > { %556 = vadd.xlane.f32.xlu0 %v555_v1  ;;  %647 = vmatpush.bf16.msra.mxu0 %v1719_v18  ;;  %v1795_v41 = vld [vmem:[%s2354_s2] ss:$0 sm:$0xff]  ;;  %v1736_v47 = vld [vmem:[%s2324_s5 + $0x8] sm:$0xff]  ;;  %v1742_v48 = vld [vmem:[%s2324_s5 + $0x38] sm:$0xff]  ;;  %s1488_s2 = sshll.u32 %s1484_s21, 4  ;;  %s1489_s2 = int_to_ptr.hbm [resolvable:$true] %s1488_s2 }
  0x22   : > { %v1814_v3 = vpop.eup %1813  ;;  %672 = vmatpush.bf16.msra.mxu2 %v1721_v19  ;;  %722 = vmatpush.bf16.msra.mxu3 %v1725_v20  ;;  %v1731_v49 = vld [vmem:[%s2323_s4 + $0x20] sm:$0xff]  ;;  %v1741_v51 = vld [vmem:[%s2324_s5 + $0x30] sm:$0xff]  ;;  %v1740_v52 = vld [vmem:[%s2324_s5 + $0x28] sm:$0xff]  ;;  %s1851_s3 = sshra.s32 %s1489_s2, 4  ;;  %s1852_s3 = int_to_ptr.hbm [resolvable:$true] %s1851_s3 }
  0x23   : > { %v559_v4 = vmul.f32 32.0, %v1814_v3  ;;  %vm563_vm1 = vweird.f32 %v1814_v3  ;;  %v1735_v50 = vld [vmem:[%s2324_s5] sm:$0xff]  ;;  %s1853_s26 = scalar_lea.hbm %s1852_s3, 8  ;;  %p1858_p0 = scmp.lt.s32.totalorder %s1852_s3, %s2336_s17 }
  0x24   : > { %935 = vmatpush.bf16.msrb.mxu1 %v1738_v27  ;;  %v1794_v39 = vld [vmem:[%s2353_s30] ss:$0 sm:$0xff]  ;;  %v1797_v54 = vld [vmem:[%s2326_s7 + $0x1] ss:$0 sm:$0xff]  ;;  %v1803_v16 = vld [vmem:[%s2326_s7 + $0x3] ss:$0 sm:$0xff]  ;;  %p1854_p11 = scmp.ne.s32.totalorder %s1852_s3, %s1853_s26 }
  0x25   : > { %v560_v5 = vsub.f32 1.0, %v559_v4  ;;  %778 = vmatpush.bf16.msrb.mxu0 %v1728_v24  ;;  %v1739_v53 = vld [vmem:[%s2324_s5 + $0x20] sm:$0xff]  ;;  %s1552_s30 = sshll.u32 %s537_s29, 3 }
  0x26   : > { %696 = vmatpush.bf16.msrb.mxu2 %v1724_v23  ;;  %853 = vmatpush.bf16.msrb.mxu3 %v1734_v25  ;;  %v1798_v59 = vld [vmem:[%s2325_s6 + $0x1] ss:$0 sm:$0xff]  ;;  %v1800_v4 = vld [vmem:[%s2326_s7] ss:$0 sm:$0xff]  ;;  %v1799_v25 = vld [vmem:[%s2325_s6 + $0x3] ss:$0 sm:$0xff]  ;;  %p1855_p12 = pnand %p1854_p11, %p2031_p5 }
  0x27   : > { %v561_v6 = vmul.f32 %v1814_v3, %v560_v5  ;;  %s539_s22 = scalar_lea.vmem [#allocation2], %s1552_s30  ;;  %s1857_s30 = scalar_lea.hbm %s2336_s17, 16 }
  0x28   : > { %936 = vmatpush.bf16.msrb.mxu1 %v1737_v32  ;;  %s1486_s23 = sshll.u32 %s539_s22, 4  ;;  %p1856_p13 = pneg %p1855_p12  ;;  %s1487_s23 = int_to_ptr.vmem [resolvable:$true] %s1486_s23 }
  0x29   : > { %v562_v7 = vadd.f32 %v1814_v3, %v561_v6  ;;  %779 = vmatpush.bf16.msrb.mxu0 %v1727_v29  ;;  %v1801_v6 = vld [vmem:[%s2327_s8 + $0x1] ss:$0 sm:$0xff]  ;;  %v1804_v29 = vld [vmem:[%s2327_s8] ss:$0 sm:$0xff]  ;;  %p1859_p1 = scmp.lt.s32.totalorder %s1857_s30, %s1853_s26 }
  0x2a   : > { %697 = vmatpush.bf16.msrb.mxu2 %v1723_v28  ;;  %854 = vmatpush.bf16.msrb.mxu3 %v1733_v31 }
  0x2b   : > { %v2050_v8 = vsel %vm563_vm1, %v1814_v3, %v562_v7  ;;  %p1860_p2 = por %p1859_p1, %p1858_p0 }
  0x2d   : > { %p1861_p3 = pnand %p1860_p2, %p1856_p13 }
  0x94   : > { %v557_v9 = vpop.xlane.xlu0 %556 }
  0x95   : > { %v565_v10 = vmul.f32 %v2050_v8, %v557_v9 }
  0x97   : > { %v566_v11 = vsub.f32 %v2046_v0, %v565_v10 }
  0x99   : > { %v567_v12 = vmul.f32 %v566_v11, %v566_v11 }
  0x9b   : > { %v568_v13 = vsel %vm554_vm0, %v567_v12, 0.0 }
  0x9c   : > { %569 = vadd.xlane.f32.xlu0 %v568_v13  ;;  %v1796_v13 = vld [vmem:[%s2325_s6] ss:$0 sm:$0xff] }
 0x10f   : > { %v570_v22 = vpop.xlane.xlu0 %569 }
 0x110   : > { %v571_v26 = vmul.f32 %v570_v22, %v2050_v8 }
 0x112   : > { %v572_v30 = vadd.f32 1e-05, %v571_v26 }
 0x114   : > { %1815 = vrsqrt.f32 %v572_v30  ;;  %vm579_vm3 = vweird.f32 %v572_v30 }
 0x11a   : > { %v1816_v33 = vpop.eup %1815 }
 0x11b   : > { %v574_v34 = vmul.f32 %v1816_v33, %v572_v30  ;;  %vm580_vm2 = vweird.f32 %v1816_v33 }
 0x11c   : > { %vm581_vm4 = vmor %vm579_vm3, %vm580_vm2 }
 0x11d   : > { %v575_v35 = vmul.f32 %v1816_v33, %v574_v34 }
 0x11f   : > { %v576_v36 = vmul.f32 0.5, %v575_v35 }
 0x121   : > { %v577_v37 = vsub.f32 1.5, %v576_v36 }
 0x123   : > { %v578_v38 = vmul.f32 %v1816_v33, %v577_v37  ;;  %v1805_v37 = vld [vmem:[%s2326_s7 + $0x2] ss:$0 sm:$0xff] }
 0x125   : > { %v582_v40 = vsel %vm581_vm4, %v1816_v33, %v578_v38  ;;  %v1806_v38 = vld [vmem:[%s2327_s8 + $0x3] ss:$0 sm:$0xff] }
 0x126   : > { %v583_v42 = vmul.f32 %v582_v40, %v566_v11 }
 0x128   : > { %v587_v43 = vmul.f32 %v1794_v39, %v583_v42 }
 0x12a   : > { %v591_v44 = vadd.f32 %v1795_v41, %v587_v43 }
 0x12c   : > { %v592_v45 = vpack.c.bf16 %v591_v44, %v591_v44 }
 0x12e   : > { %1562 = vmatmul.msk.bf16.vlgmr.msra.gmra.mxu0 %vm554_vm0, %v592_v45  ;;  %1571 = vmatmul.msk.bf16.vlgmr.msra.gmra.mxu2 %vm554_vm0, %v592_v45 }
 0x12f   : > { %1589 = vmatmul.msk.bf16.vlgmr.msra.gmra.mxu3 %vm554_vm0, %v592_v45  ;;  %1607 = vmatmul.msk.bf16.vlgmr.msra.gmra.mxu1 %vm554_vm0, %v592_v45 }
 0x130   : > { %828 = vmatpush.bf16.msra.mxu2 %v1732_v46  ;;  %910 = vmatpush.bf16.msra.mxu0 %v1736_v47 }
 0x131   : > { %985 = vmatpush.bf16.msra.mxu3 %v1742_v48 }
 0x134   : > { %829 = vmatpush.bf16.msra.mxu2 %v1731_v49  ;;  %911 = vmatpush.bf16.msra.mxu0 %v1735_v50 }
 0x135   : > { %986 = vmatpush.bf16.msra.mxu3 %v1741_v51 }
 0x13e   : > { %1580 = vmatmul.msk.bf16.vlgmr.msrb.gmra.mxu2 %vm554_vm0, %v592_v45  ;;  %1598 = vmatmul.msk.bf16.vlgmr.msrb.gmra.mxu0 %vm554_vm0, %v592_v45 }
 0x13f   : > { %1625 = vmatmul.msk.bf16.vlgmr.msrb.gmra.mxu3 %vm554_vm0, %v592_v45  ;;  %1643 = vmatmul.msk.bf16.vlgmr.msrb.gmra.mxu1 %vm554_vm0, %v592_v45 }
 0x140   : > { %960 = vmatpush.bf16.msrb.mxu2 %v1740_v52 }
 0x144   : > { %961 = vmatpush.bf16.msrb.mxu2 %v1739_v53 }
 0x14e   : > { %1616 = vmatmul.msk.bf16.vlgmr.msra.gmra.mxu2 %vm554_vm0, %v592_v45  ;;  %1634 = vmatmul.msk.bf16.vlgmr.msra.gmra.mxu0 %vm554_vm0, %v592_v45 }
 0x14f   : > { %1661 = vmatmul.msk.bf16.vlgmr.msra.gmra.mxu3 %vm554_vm0, %v592_v45 }
 0x15e   : > { %1652 = vmatmul.msk.bf16.vlgmr.msrb.gmra.mxu2 %vm554_vm0, %v592_v45  ;;  %v1802_v45 = vld [vmem:[%s2325_s6 + $0x2] ss:$0 sm:$0xff] }
 0x1ab   : > { %v649_v55 = vpop.f32.mrf.mxu0 }
 0x1ac   : > { %v806_v56 = vpop.f32.mrf.mxu1  ;;  %v650_v20 = vadd.f32 %v1796_v13, %v649_v55 }
 0x1ad   : > { %v807_v57 = vadd.f32 %v1797_v54, %v806_v56  ;;  %v1807_v54 = vld [vmem:[%s2327_s8 + $0x2] ss:$0 sm:$0xff] }
 0x1ae   : > { %v992_v27 = vpack.c.bf16 %v650_v20, %v650_v20 }
 0x1af   : > { %v997_v58 = vpack.c.bf16 %v807_v57, %v807_v57 }
 0x1b1   : > { %v1024_v60 = vsel %vm1000_vm5, %v997_v58, 0  ;;  %v674_v61 = vpop.f32.mrf.mxu2 }
 0x1b2   : > { %v724_v62 = vpop.f32.mrf.mxu3  ;;  %1033 = vmatpush.bf16.xpose.msra.mxu1 %v1024_v60  ;;  %v675_v63 = vadd.f32 %v1798_v59, %v674_v61  ;;  %v546_v61 = vlaneseq }
 0x1b3   : > { %v651_v1 = vpop.f32.mrf.mxu0  ;;  %v725_v30 = vadd.f32 %v1799_v25, %v724_v62 }
 0x1b4   : > { %v808_v2 = vpop.f32.mrf.mxu1  ;;  %v993_v3 = vpack.c.bf16 %v675_v63, %v675_v63  ;;  %v547_v63 = vshrl.u32 %v546_v61, 7  ;;  %v549_v1 = vand.u32 127, %v546_v61 }
 0x1b5   : > { %v995_v35 = vpack.c.bf16 %v725_v30, %v725_v30 }
 0x1b6   : > { %vm550_vm7 = vcmp.le.s32.totalorder %v549_v1, %v547_v63  ;;  %v1220_v63 = vld [vmem:[%s2328_s9 + $0x8] sm:$0xf] }
 0x1b7   : > { %v1264_v1 = vsel %vm1140_vm6, %v1220_v63, 0  ;;  %v1746_v63 = vld [vmem:[%s2334_s15 + $0x8] sm:$0xff] }
 0x1b9   : > { %1663 = vmatmul.msk.bf16.vlgmr.msra.gmra.mxu1 %vm1000_vm5, %v993_v3  ;;  %v676_v5 = vpop.f32.mrf.mxu2 }
 0x1ba   : > { %v726_v7 = vpop.f32.mrf.mxu3 }
 0x1bb   : > { %v781_v9 = vpop.f32.mrf.mxu0 }
 0x1bc   : > { %v782_v10 = vadd.f32 %v1800_v4, %v781_v9  ;;  %v938_v11 = vpop.f32.mrf.mxu1  ;;  %v1902_v4 = vmov -1e+30  }
 0x1bd   : > { %v939_v12 = vadd.f32 %v1801_v6, %v938_v11  ;;  %v551_v5 = vsel %vm550_vm7, 0.0, %v1902_v4  ;;  %v1221_v4 = vld [vmem:[%s2328_s9 + $0xc] sm:$0xf] }
 0x1be   : > { %v996_v14 = vpack.c.bf16 %v782_v10, %v782_v10 }
 0x1bf   : > { %v1134_v15 = vpack.c.bf16 %v939_v12, %v939_v12 }
 0x1c0   : > { %v1005_v17 = vsel %vm1000_vm5, %v996_v14, 0 }
 0x1c1   : > { %v1161_v18 = vsel %vm1140_vm6, %v1134_v15, 0  ;;  %v699_v19 = vpop.f32.mrf.mxu2  ;;  %1014 = vmatpush.bf16.xpose.msrb.mxu0 %v1005_v17 }
 0x1c2   : > { %v856_v21 = vpop.f32.mrf.mxu3  ;;  %1170 = vmatpush.bf16.msrb.mxu1 %v1161_v18  ;;  %v700_v50 = vadd.f32 %v1802_v45, %v699_v19 }
 0x1c3   : > { %v857_v22 = vadd.f32 %v1803_v16, %v856_v21  ;;  %v783_v23 = vpop.f32.mrf.mxu0 }
 0x1c4   : > { %v940_v24 = vpop.f32.mrf.mxu1  ;;  %v994_v53 = vpack.c.bf16 %v700_v50, %v700_v50 }
 0x1c5   : > { %v999_v26 = vpack.c.bf16 %v857_v22, %v857_v22 }
 0x1c7   : > { %v1062_v28 = vsel %vm1000_vm5, %v999_v26, 0 }
 0x1c8   : > { %1071 = vmatpush.bf16.xpose.msrb.mxu3 %v1062_v28  ;;  %1662 = vmatmul.msk.bf16.vlgmr.msrb.gmra.mxu0 %vm1000_vm5, %v992_v27 }
 0x1c9   : > { %v701_v31 = vpop.f32.mrf.mxu2 }
 0x1ca   : > { %v858_v32 = vpop.f32.mrf.mxu3 }
 0x1cb   : > { %v913_v33 = vpop.f32.mrf.mxu0 }
 0x1cc   : > { %v914_v34 = vadd.f32 %v1804_v29, %v913_v33 }
 0x1ce   : > { %v1133_v36 = vpack.c.bf16 %v914_v34, %v914_v34 }
 0x1cf   : > { %1665 = vmatmul.msk.bf16.vlgmr.msrb.gmra.mxu3 %vm1000_vm5, %v995_v35 }
 0x1d0   : > { %v1142_v39 = vsel %vm1140_vm6, %v1133_v36, 0 }
 0x1d1   : > { %v831_v40 = vpop.f32.mrf.mxu2  ;;  %1151 = vmatpush.bf16.msra.mxu0 %v1142_v39 }
 0x1d2   : > { %v832_v41 = vadd.f32 %v1805_v37, %v831_v40  ;;  %v988_v42 = vpop.f32.mrf.mxu3 }
 0x1d3   : > { %v989_v43 = vadd.f32 %v1806_v38, %v988_v42  ;;  %v915_v44 = vpop.f32.mrf.mxu0 }
 0x1d4   : > { %v998_v46 = vpack.c.bf16 %v832_v41, %v832_v41 }
 0x1d5   : > { %v1136_v47 = vpack.c.bf16 %v989_v43, %v989_v43 }
 0x1d6   : > { %v1043_v48 = vsel %vm1000_vm5, %v998_v46, 0 }
 0x1d7   : > { %v1199_v49 = vsel %vm1140_vm6, %v1136_v47, 0  ;;  %1052 = vmatpush.bf16.xpose.msra.mxu2 %v1043_v48 }
 0x1d8   : > { %1208 = vmatpush.bf16.msra.mxu3 %v1199_v49 }
 0x1d9   : > { %v833_v51 = vpop.f32.mrf.mxu2 }
 0x1da   : > { %v990_v52 = vpop.f32.mrf.mxu3 }
 0x1de   : > { %1664 = vmatmul.msk.bf16.vlgmr.msra.gmra.mxu2 %vm1000_vm5, %v994_v53 }
 0x1e1   : > { %v963_v55 = vpop.f32.mrf.mxu2 }
 0x1e2   : > { %v964_v56 = vadd.f32 %v1807_v54, %v963_v55 }
 0x1e4   : > { %v1135_v57 = vpack.c.bf16 %v964_v56, %v964_v56 }
 0x1e6   : > { %v1180_v58 = vsel %vm1140_vm6, %v1135_v57, 0 }
 0x1e7   : > { %1189 = vmatpush.bf16.msrb.mxu2 %v1180_v58 }
 0x1e9   : > { %v965_v59 = vpop.f32.mrf.mxu2 }
 0x1ea   : > { %v1218_v59 = vld [vmem:[%s2328_s9] sm:$0xf] }
 0x1eb   : > { %1273 = vmatpush.bf16.msra.mxu2 %v1264_v1  ;;  %v1745_v1 = vld [vmem:[%s2334_s15] sm:$0xff] }
 0x236   : > { %v1035_v60 = vpop.f32.mrf.mxu1 }
 0x237   : > { %v1078_v7 = vmul.f32 0.35355338, %v1035_v60  ;;  %v1226_v60 = vsel %vm1140_vm6, %v1218_v59, 0  ;;  %v1750_v59 = vld [vmem:[%s2334_s15 + $0x28] sm:$0xff] }
 0x238   : > { %1235 = vmatpush.bf16.msrb.mxu0 %v1226_v60  ;;  %v1749_v60 = vld [vmem:[%s2334_s15 + $0x20] sm:$0xff] }
 0x239   : > { %v1082_v11 = vadd.f32 %v1078_v7, %v551_v5 }
 0x23b   : > { %v1088_v13 = vsel %vm1000_vm5, %v1082_v11, -inf }
 0x23e   : > { %v1037_v62 = vpop.f32.mrf.mxu1 }
 0x245   : > { %v1016_v2 = vpop.f32.mrf.mxu0 }
 0x246   : > { %v1077_v3 = vmul.f32 0.35355338, %v1016_v2  ;;  %v1219_v2 = vld [vmem:[%s2328_s9 + $0x4] sm:$0xf] }
 0x248   : > { %v1081_v6 = vadd.f32 %v1077_v3, %v551_v5  ;;  %v1245_v3 = vsel %vm1140_vm6, %v1219_v2, 0  ;;  %v1811_v2 = vld [vmem:[%s2333_s14] ss:$0 sm:$0xff] }
 0x249   : > { %1254 = vmatpush.bf16.msra.mxu1 %v1245_v3 }
 0x24a   : > { %v1085_v9 = vsel %vm1000_vm5, %v1081_v6, -inf }
 0x24b   : > { %1086 = vmax.xlane.f32.xlu2 %v1085_v9 }
 0x24d   : > { %v1018_v10 = vpop.f32.mrf.mxu0 }
 0x252   : > { %v1073_v12 = vpop.f32.mrf.mxu3 }
 0x253   : > { %1089 = vmax.xlane.f32.xlu2 %v1088_v13  ;;  %v1080_v18 = vmul.f32 0.35355338, %v1073_v12 }
 0x255   : > { %v1084_v21 = vadd.f32 %v1080_v18, %v551_v5 }
 0x257   : > { %v1094_v22 = vsel %vm1000_vm5, %v1084_v21, -inf }
 0x25a   : > { %v1075_v14 = vpop.f32.mrf.mxu3 }
 0x261   : > { %v1054_v15 = vpop.f32.mrf.mxu2 }
 0x262   : > { %v1079_v16 = vmul.f32 0.35355338, %v1054_v15 }
 0x264   : > { %v1083_v17 = vadd.f32 %v1079_v16, %v551_v5  ;;  %v1283_v5 = vsel %vm1140_vm6, %v1221_v4, 0 }
 0x265   : > { %1292 = vmatpush.bf16.msrb.mxu3 %v1283_v5 }
 0x266   : > { %v1091_v19 = vsel %vm1000_vm5, %v1083_v17, -inf }
 0x267   : > { %1092 = vmax.xlane.f32.xlu1 %v1091_v19 }
 0x269   : > { %v1056_v20 = vpop.f32.mrf.mxu2 }
 0x26f   : > { %1095 = vmax.xlane.f32.xlu1 %v1094_v22 }
 0x2be   : > { %v1087_v23 = vpop.xlane.xlu2 %1086 }
 0x2bf   : > { %v1097_v24 = vsub.f32 %v1081_v6, %v1087_v23 }
 0x2c1   : > { %v1101_v25 = vmul.f32 1.442695, %v1097_v24 }
 0x2c3   : > { %1817 = vpow2.f32 %v1101_v25 }
 0x2c6   : > { %v1090_v28 = vpop.xlane.xlu2 %1089 }
 0x2c7   : > { %v1098_v31 = vsub.f32 %v1082_v11, %v1090_v28 }
 0x2c9   : > { %v1818_v26 = vpop.eup %1817  ;;  %v1103_v33 = vmul.f32 1.442695, %v1098_v31 }
 0x2ca   : > { %v1109_v27 = vsel %vm1000_vm5, %v1818_v26, 0.0 }
 0x2cb   : > { %1110 = vadd.xlane.f32.xlu2 %v1109_v27 }
 0x2da   : > { %v1093_v29 = vpop.xlane.xlu1 %1092 }
 0x2db   : > { %v1099_v30 = vsub.f32 %v1083_v17, %v1093_v29  ;;  %v1808_v29 = vld [vmem:[%s2329_s10] ss:$0 sm:$0xff] }
 0x2dd   : > { %v1105_v32 = vmul.f32 1.442695, %v1099_v30 }
 0x2df   : > { %1819 = vpow2.f32 %v1105_v32 }
 0x2e0   : > { %1821 = vpow2.f32 %v1103_v33 }
 0x2e2   : > { %v1096_v34 = vpop.xlane.xlu1 %1095 }
 0x2e3   : > { %v1100_v35 = vsub.f32 %v1084_v21, %v1096_v34 }
 0x2e5   : > { %v1820_v36 = vpop.eup %1819  ;;  %v1107_v37 = vmul.f32 1.442695, %v1100_v35 }
 0x2e6   : > { %v1115_v38 = vsel %vm1000_vm5, %v1820_v36, 0.0  ;;  %v1822_v39 = vpop.eup %1821 }
 0x2e7   : > { %1823 = vpow2.f32 %v1107_v37  ;;  %1116 = vadd.xlane.f32.xlu0 %v1115_v38  ;;  %v1112_v42 = vsel %vm1000_vm5, %v1822_v39, 0.0 }
 0x2ed   : > { %v1824_v40 = vpop.eup %1823 }
 0x2ee   : > { %v1118_v41 = vsel %vm1000_vm5, %v1824_v40, 0.0 }
 0x2ef   : > { %1119 = vadd.xlane.f32.xlu1 %v1118_v41  ;;  %1113 = vadd.xlane.f32.xlu0 %v1112_v42  ;;  %v1744_v41 = vld [vmem:[%s2332_s13 + $0x8] sm:$0xff]  ;;  %v1752_v42 = vld [vmem:[%s2334_s15 + $0x38] sm:$0xff] }
 0x33e   : > { %v1111_v43 = vpop.xlane.xlu2 %1110 }
 0x33f   : > { %1825 = vrcp.f32 %v1111_v43 }
 0x345   : > { %v1826_v44 = vpop.eup %1825 }
 0x346   : > { %v1125_v45 = vmul.f32 %v1826_v44, %v1818_v26 }
 0x348   : > { %v1129_v46 = vpack.c.bf16 %v1125_v45, %v1125_v45  ;;  %v1751_v45 = vld [vmem:[%s2334_s15 + $0x30] sm:$0xff] }
 0x34a   : > { %1666 = vmatmul.msk.bf16.vlgmr.msra.gmra.mxu0 %vm1000_vm5, %v1129_v46 }
 0x34b   : > { %1373 = vmatpush.bf16.msra.mxu0 %v1744_v41 }
 0x35a   : > { %v1117_v47 = vpop.xlane.xlu0 %1116 }
 0x35b   : > { %1827 = vrcp.f32 %v1117_v47 }
 0x361   : > { %v1828_v48 = vpop.eup %1827 }
 0x362   : > { %v1127_v49 = vmul.f32 %v1828_v48, %v1820_v36  ;;  %v1120_v50 = vpop.xlane.xlu1 %1119  ;;  %v1114_v51 = vpop.xlane.xlu0 %1113 }
 0x363   : > { %1829 = vrcp.f32 %v1120_v50 }
 0x364   : > { %v1131_v52 = vpack.c.bf16 %v1127_v49, %v1127_v49  ;;  %1831 = vrcp.f32 %v1114_v51 }
 0x366   : > { %1668 = vmatmul.msk.bf16.vlgmr.msrb.gmra.mxu2 %vm1000_vm5, %v1131_v52 }
 0x369   : > { %v1830_v53 = vpop.eup %1829 }
 0x36a   : > { %v1832_v54 = vpop.eup %1831  ;;  %v1128_v55 = vmul.f32 %v1830_v53, %v1824_v40 }
 0x36b   : > { %v1126_v56 = vmul.f32 %v1832_v54, %v1822_v39 }
 0x36c   : > { %v1132_v57 = vpack.c.bf16 %v1128_v55, %v1128_v55  ;;  %v1810_v55 = vld [vmem:[%s2331_s12] ss:$0 sm:$0xff] }
 0x36d   : > { %v1130_v58 = vpack.c.bf16 %v1126_v56, %v1126_v56 }
 0x36e   : > { %1669 = vmatmul.msk.bf16.vlgmr.msra.gmra.mxu3 %vm1000_vm5, %v1132_v57 }
 0x36f   : > { %1667 = vmatmul.msk.bf16.vlgmr.msrb.gmra.mxu1 %vm1000_vm5, %v1130_v58 }
 0x370   : > { %1458 = vmatpush.bf16.msrb.mxu1 %v1752_v42 }
 0x374   : > { %1459 = vmatpush.bf16.msrb.mxu1 %v1751_v45 }
 0x378   : > { %1460 = vmatpush.bf16.msrb.mxu1 %v1750_v59 }
 0x37c   : > { %1461 = vmatpush.bf16.msrb.mxu1 %v1749_v60 }
 0x3c7   : > { %v1153_v61 = vpop.f32.mrf.mxu0 }
 0x3c8   : > { %v1214_v62 = vpack.c.bf16 %v1153_v61, %v1153_v61  ;;  %v1748_v61 = vld [vmem:[%s2334_s15 + $0x18] sm:$0xff] }
 0x3c9   : > { %1462 = vmatpush.bf16.msrb.mxu1 %v1748_v61 }
 0x3ca   : > { %1670 = vmatmul.msk.bf16.vlgmr.msrb.gmra.mxu0 %vm1000_vm5, %v1214_v62  ;;  %v1747_v62 = vld [vmem:[%s2334_s15 + $0x10] sm:$0xff] }
 0x3cd   : > { %1463 = vmatpush.bf16.msrb.mxu1 %v1747_v62 }
 0x3cf   : > { %v1155_v6 = vpop.f32.mrf.mxu0 }
 0x3d1   : > { %1464 = vmatpush.bf16.msrb.mxu1 %v1746_v63 }
 0x3d5   : > { %1465 = vmatpush.bf16.msrb.mxu1 %v1745_v1 }
 0x3e9   : > { %v1191_v7 = vpop.f32.mrf.mxu2 }
 0x3ea   : > { %v1216_v9 = vpack.c.bf16 %v1191_v7, %v1191_v7 }
 0x3ec   : > { %v1172_v10 = vpop.f32.mrf.mxu1  ;;  %1672 = vmatmul.msk.bf16.vlgmr.msra.gmra.mxu2 %vm1000_vm5, %v1216_v9 }
 0x3ed   : > { %v1215_v11 = vpack.c.bf16 %v1172_v10, %v1172_v10 }
 0x3ef   : > { %1671 = vmatmul.msk.bf16.vlgmr.msra.gmra.mxu1 %vm1000_vm5, %v1215_v11 }
 0x3f1   : > { %v1193_v12 = vpop.f32.mrf.mxu2  ;;  %v1210_v13 = vpop.f32.mrf.mxu3 }
 0x3f2   : > { %v1217_v14 = vpack.c.bf16 %v1210_v13, %v1210_v13 }
 0x3f4   : > { %v1174_v15 = vpop.f32.mrf.mxu1  ;;  %1673 = vmatmul.msk.bf16.vlgmr.msrb.gmra.mxu3 %vm1000_vm5, %v1217_v14 }
 0x3f9   : > { %v1212_v16 = vpop.f32.mrf.mxu3 }
 0x447   : > { %v1237_v17 = vpop.f32.mrf.mxu0 }
 0x448   : > { %v1298_v22 = vsel %vm554_vm0, %v1237_v17, 0.0  ;;  %v1812_v17 = vld [vmem:[%s2335_s16] ss:$0 sm:$0xff] }
 0x44f   : > { %v1239_v18 = vpop.f32.mrf.mxu0 }
 0x46c   : > { %v1256_v19 = vpop.f32.mrf.mxu1 }
 0x46d   : > { %v1299_v21 = vsel %vm554_vm0, %v1256_v19, 0.0 }
 0x46e   : > { %v1300_v25 = vadd.f32 %v1299_v21, %v1298_v22 }
 0x46f   : > { %v1275_v20 = vpop.f32.mrf.mxu2 }
 0x470   : > { %v1301_v23 = vsel %vm554_vm0, %v1275_v20, 0.0 }
 0x471   : > { %v1302_v26 = vadd.f32 %v1301_v23, %v1300_v25 }
 0x474   : > { %v1258_v24 = vpop.f32.mrf.mxu1 }
 0x477   : > { %v1277_v27 = vpop.f32.mrf.mxu2  ;;  %v1294_v28 = vpop.f32.mrf.mxu3 }
 0x478   : > { %v1303_v30 = vsel %vm554_vm0, %v1294_v28, 0.0 }
 0x479   : > { %v1304_v31 = vadd.f32 %v1303_v30, %v1302_v26 }
 0x47b   : > { %v1309_v32 = vadd.f32 %v1808_v29, %v1304_v31 }
 0x47d   : > { %v2234_v33 = vadd.f32 %v1309_v32, %v2046_v0  ;;  %v1743_v0 = vld [vmem:[%s2332_s13] sm:$0xff] }
 0x47e   : > { %1374 = vmatpush.bf16.msra.mxu0 %v1743_v0 }
 0x47f   : > { %v1296_v34 = vpop.f32.mrf.mxu3  ;;  %v1313_v35 = vsel %vm554_vm0, %v2234_v33, 0.0 }
 0x480   : > { %1314 = vadd.xlane.f32.xlu1 %v1313_v35 }
 0x4f3   : > { %v1315_v36 = vpop.xlane.xlu1 %1314 }
 0x4f4   : > { %v1316_v37 = vmul.f32 %v1315_v36, %v2050_v8 }
 0x4f6   : > { %v1317_v38 = vsub.f32 %v2234_v33, %v1316_v37 }
 0x4f8   : > { %v1318_v39 = vmul.f32 %v1317_v38, %v1317_v38 }
 0x4fa   : > { %v1319_v40 = vsel %vm554_vm0, %v1318_v39, 0.0 }
 0x4fb   : > { %1320 = vadd.xlane.f32.xlu2 %v1319_v40 }
 0x56e   : > { %v1321_v43 = vpop.xlane.xlu2 %1320 }
 0x56f   : > { %v1322_v44 = vmul.f32 %v1321_v43, %v2050_v8  ;;  %v1809_v8 = vld [vmem:[%s2330_s11] ss:$0 sm:$0xff] }
 0x571   : > { %v1323_v46 = vadd.f32 1e-05, %v1322_v44 }
 0x573   : > { %1833 = vrsqrt.f32 %v1323_v46  ;;  %vm1330_vm9 = vweird.f32 %v1323_v46 }
 0x579   : > { %v1834_v47 = vpop.eup %1833 }
 0x57a   : > { %v1325_v48 = vmul.f32 %v1834_v47, %v1323_v46  ;;  %vm1331_vm8 = vweird.f32 %v1834_v47 }
 0x57b   : > { %vm1332_vm10 = vmor %vm1330_vm9, %vm1331_vm8 }
 0x57c   : > { %v1326_v49 = vmul.f32 %v1834_v47, %v1325_v48 }
 0x57e   : > { %v1327_v50 = vmul.f32 0.5, %v1326_v49 }
 0x580   : > { %v1328_v51 = vsub.f32 1.5, %v1327_v50 }
 0x582   : > { %v1329_v52 = vmul.f32 %v1834_v47, %v1328_v51 }
 0x584   : > { %v1333_v53 = vsel %vm1332_vm10, %v1834_v47, %v1329_v52 }
 0x585   : > { %v1334_v54 = vmul.f32 %v1333_v53, %v1317_v38 }
 0x587   : > { %v1338_v56 = vmul.f32 %v1809_v8, %v1334_v54 }
 0x589   : > { %v1342_v57 = vadd.f32 %v1810_v55, %v1338_v56 }
 0x58b   : > { %v1343_v58 = vpack.c.bf16 %v1342_v57, %v1342_v57 }
 0x58d   : > { %1682 = vmatmul.msk.bf16.vlgmr.msra.gmra.mxu0 %vm554_vm0, %v1343_v58 }
 0x60a   : > { %v1376_v3 = vpop.f32.mrf.mxu0 }
 0x60b   : > { %v1377_v4 = vadd.f32 %v1811_v2, %v1376_v3 }
 0x60d   : > { %v1381_v5 = vmul.f32 0.044715, %v1377_v4  ;;  %v1380_v13 = vmul.f32 0.5, %v1377_v4 }
 0x60f   : > { %v1382_v6 = vmul.f32 %v1381_v5, %v1377_v4 }
 0x611   : > { %v1383_v7 = vmul.f32 %v1382_v6, %v1377_v4 }
 0x612   : > { %v1378_v9 = vpop.f32.mrf.mxu0 }
 0x613   : > { %v1384_v10 = vadd.f32 %v1383_v7, %v1377_v4 }
 0x615   : > { %v1385_v11 = vmul.f32 0.7978846, %v1384_v10 }
 0x617   : > { %1835 = vtanh.f32 %v1385_v11 }
 0x61d   : > { %v1836_v12 = vpop.eup %1835 }
 0x61e   : > { %v1387_v14 = vadd.f32 1.0, %v1836_v12 }
 0x620   : > { %v1388_v15 = vmul.f32 %v1387_v14, %v1380_v13 }
 0x622   : > { %v1389_v16 = vpack.c.bf16 %v1388_v15, %v1388_v15 }
 0x624   : > { %1466 = vmatmul.bf16.vlgmr.msrb.gmra.mxu1 %v1389_v16 }
 0x6a1   : > { %v1467_v18 = vpop.f32.mrf.mxu1 }
 0x6a2   : > { %v1468_v19 = vadd.f32 %v1812_v17, %v1467_v18 }
 0x6a4   : > { %v1471_v20 = vadd.f32 %v1468_v19, %v2234_v33 }
 0x6a6   : > { %1472 = vst.msk [vmem:[%s539_s22] sm:$0xff] %vm554_vm0, %v1471_v20 }
 0x6a7   : > { %1864 = shalt.err (!%p1861_p3)
}
 0x6a8   : > { %1753 = dma.vmem_to_hbm [thread:$0]  (%p2031_p5), %s1487_s23, 128, %s1489_s2, %s1474_s28  }
 0x6a9   : > { %v1469_v21 = vpop.f32.mrf.mxu1 }
 0x6aa PF: > { %p1759_p4 = scmp.ge.s32.totalorder %s1899_s27, 2  ;;  %s1500_s21 = sand.u32 1, %s1887_s24  }
 0x6ab   : > { %s1501_s22 = scalar_lea.sflag [#allocation3], %s1500_s21 }
 0x6ac   : > { %p1756_p7 = pnand %p1759_p4, %p2035_p6 }
 0x6ae   : > { %p1757_p8 = pneg %p1756_p7 }
 0x6b0   : > { %1882 = dma.done.wait (%p1757_p8), %s1501_s22, 128  }
 0x6b1   : > { %1884 = vsyncadd (%p1757_p8), %s1501_s22, 4294967168  ;;  %s2356_s27 = sld [smem:[#allocation6_spill]]  ;;  %s2359_s24 = smov %s1891_s25 }
 0x6b2   : > { %s2357_s3 = sld [smem:[#allocation5_spill]] }
 0x6b3   : > { %s2358_s26 = sld [smem:[#allocation7_spill]] }
 0x6b7   : > { %p27_p9 = scmp.ge.s32.totalorder %s2356_s27, 4  }
 0x6b8   : > { %s2360_s25 = smov %s2357_s3 }
 0x6b9   :  { %29 = sbr.rel (!%p27_p9) target bundleno = 8 (0x8), region = 123 }
 0x6be   :  { %1507 = vsyncpa [#allocation3], 1 }
 0x6bf   :  { %1509 = vsyncpa [#allocation3 + $0x1], 1 }

</bundles_post_ra>
